<compile_context>
chip_gen: v7x
topology: tpu7x:2x2x1
jax: 0.10.0
libtpu: 0.0.40
codegen_flags: <defaults>
</compile_context>

<pallas_src>
import jax
import jax.numpy as jnp
from jax.experimental import pallas as pl
from jax.experimental.pallas import tpu as pltpu


def _poi2d_kernel(a_ref, x_ref, o_ref):
    # a_ref : SMEM, shape (1,)          -- scalar multiplier (scalar prefetch)
    # x_ref : VMEM, shape (2, TR, 128)  -- dense [x0 slab ; x1 slab]
    # o_ref : VMEM, shape (TR, 128)     -- per-row result, fully dense
    neg_a = -a_ref[0]
    x0 = x_ref[0]                      # (TR, 128) contiguous slab
    x1 = x_ref[1]                      # (TR, 128) contiguous slab
    # -a * (x0^2 - x0 + x1^2 - x1) == -a * (x0*(x0-1) + x1*(x1-1))
    o_ref[...] = neg_a * (x0 * (x0 - 1.0) + x1 * (x1 - 1.0))


def poi2d_with_a(x, a, *, tile_rows: int = 2048, min_tiles: int = 8):
    """x: (N, D>=2) array, a: scalar -> (N, 1) float32.

    tile_rows: sublane-rows per tile (128 input rows each); 2048 -> 256K rows,
               ~3 MiB of HBM traffic per grid step.
    min_tiles: soft lower bound on grid length so v7x's two TCs share work.
    """
    x = jnp.asarray(x, jnp.float32)
    n = x.shape[0]

    # Only the two used feature columns; rows map to lanes.
    # TODO(synk): this transpose/pad is a separate XLA layout pass (~1 extra
    # HBM round-trip of the input); cache the (2, R, 128) slab across calls if
    # the same x is reused.
    xt = x[:, :2].T                                        # (2, N)

    # Pad N to a multiple of 8*128 = 1024 so the slab is (8,128)-tile dense.
    n_pad = -(-n // 1024) * 1024
    if n_pad != n:
        xt = jnp.pad(xt, ((0, 0), (0, n_pad - n)))
    r = n_pad // 128
    xt = xt.reshape(2, r, 128)                             # contiguous -> free

    # Choose tile rows: as large as tile_rows, but aim for >= min_tiles steps.
    tr_balanced = -(-r // min_tiles)                       # ceil(r / min_tiles)
    tr_balanced = -(-tr_balanced // 8) * 8                 # round up to mult of 8
    tr = max(8, min(tile_rows, tr_balanced))
    tr = min(tr, r)
    grid = (pl.cdiv(r, tr),)                               # ragged last block OK

    a_arr = jnp.asarray(a, jnp.float32).reshape(1)

    out = pl.pallas_call(
        _poi2d_kernel,
        out_shape=jax.ShapeDtypeStruct((r, 128), jnp.float32),
        grid_spec=pltpu.PrefetchScalarGridSpec(
            num_scalar_prefetch=1,                         # `a` lands in SMEM
            grid=grid,
            in_specs=[
                pl.BlockSpec((2, tr, 128), lambda i, a_ref: (0, i, 0)),
            ],
            out_specs=pl.BlockSpec((tr, 128), lambda i, a_ref: (i, 0)),
        ),
        compiler_params=pltpu.CompilerParams(
            dimension_semantics=("parallel",),             # v7x: split across TCs
        ),
    )(a_arr, xt)

    # Flatten the dense slab back to rows; padded rows (zeros) are sliced off.
    return out.reshape(-1)[:n].reshape(n, 1)


if __name__ == "__main__":
    key = jax.random.PRNGKey(0)
    # Small shapes consistent with the module: batch of 8 samples, 2 features.
    x = jax.random.normal(key, (8, 2), dtype=jnp.float32)
    a = 2.5

    out = poi2d_with_a(x, a)
    jax.block_until_ready(out)

    # Pure-JAX reference of the PyTorch loop.
    ref = (-a * (x[:, 0] ** 2 - x[:, 0] + x[:, 1] ** 2 - x[:, 1]))[:, None]
    assert out.shape == (8, 1), out.shape
    assert jnp.allclose(out, ref, atol=1e-5, rtol=1e-5), (out, ref)

    print("KERNEL_OK")
</pallas_src>

<mosaic_0001>
module attributes {stable_mosaic.version = 11 : i64} {
  func.func @_poi2d_kernel(%arg0: i32, %arg1: memref<1xf32, #tpu.memory_space<smem>>, %arg2: memref<2x8x128xf32, #tpu.memory_space<vmem>>, %arg3: memref<8x128xf32, #tpu.memory_space<vmem>>) attributes {dimension_semantics = [#tpu.dimension_semantics<parallel>], iteration_bounds = array<i64: 1>, scalar_prefetch = 1 : i64, scratch_operands = 0 : i64, tpu.core_type = #tpu.core_type<tc>, window_params = [{transform_indices = @transform_0, window_bounds = array<i64: 2, 8, 128>}, {transform_indices = @transform_1, window_bounds = array<i64: 8, 128>}]} {
    %c0 = arith.constant 0 : index
    %0 = memref.load %arg1[%c0] : memref<1xf32, #tpu.memory_space<smem>>
    %cst = arith.constant 0.000000e+00 : f32
    %1 = arith.subf %cst, %0 : f32
    %c0_0 = arith.constant 0 : index
    %c0_1 = arith.constant 0 : index
    %c0_2 = arith.constant 0 : index
    %2 = vector.load %arg2[%c0_0, %c0_1, %c0_2] : memref<2x8x128xf32, #tpu.memory_space<vmem>>, vector<1x8x128xf32>
    %3 = vector.shape_cast %2 : vector<1x8x128xf32> to vector<8x128xf32>
    %c1 = arith.constant 1 : index
    %c0_3 = arith.constant 0 : index
    %c0_4 = arith.constant 0 : index
    %4 = vector.load %arg2[%c1, %c0_3, %c0_4] : memref<2x8x128xf32, #tpu.memory_space<vmem>>, vector<1x8x128xf32>
    %5 = vector.shape_cast %4 : vector<1x8x128xf32> to vector<8x128xf32>
    %cst_5 = arith.constant 1.000000e+00 : f32
    %6 = vector.broadcast %cst_5 : f32 to vector<8x128xf32>
    %7 = arith.subf %3, %6 : vector<8x128xf32>
    %8 = arith.mulf %3, %7 : vector<8x128xf32>
    %cst_6 = arith.constant 1.000000e+00 : f32
    %9 = vector.broadcast %cst_6 : f32 to vector<8x128xf32>
    %10 = arith.subf %5, %9 : vector<8x128xf32>
    %11 = arith.mulf %5, %10 : vector<8x128xf32>
    %12 = arith.addf %8, %11 : vector<8x128xf32>
    %13 = vector.broadcast %1 : f32 to vector<8x128xf32>
    %14 = arith.mulf %13, %12 : vector<8x128xf32>
    %c0_7 = arith.constant 0 : index
    %c0_8 = arith.constant 0 : index
    %15 = vector.load %arg3[%c0_7, %c0_8] : memref<8x128xf32, #tpu.memory_space<vmem>>, vector<8x128xf32>
    tpu.vector_store %arg3[%c0_7, %c0_8], %14 {strides = array<i32>} : memref<8x128xf32, #tpu.memory_space<vmem>>, vector<8x128xf32>,
    return
  }
  func.func @transform_0(%arg0: i32, %arg1: memref<1xf32, #tpu.memory_space<smem>>) -> (i32, i32, i32) {
    %c0_i32 = arith.constant 0 : i32
    %c0_i32_0 = arith.constant 0 : i32
    %c0_i32_1 = arith.constant 0 : i32
    return %c0_i32, %arg0, %c0_i32_0 : i32, i32, i32
  }
  func.func @transform_1(%arg0: i32, %arg1: memref<1xf32, #tpu.memory_space<smem>>) -> (i32, i32) {
    %c0_i32 = arith.constant 0 : i32
    %c0_i32_0 = arith.constant 0 : i32
    return %arg0, %c0_i32 : i32, i32
  }
}

</mosaic_0001>

<bundles_post_ra>
// kernel: tpu_custom_call.1
= control target key start
LH: loop header
LB: loop body
LE: loop exit
PB: predicated region body
PF: predicated region fallthrough
CT: control target
= control target key end

     0   :  { %8 = vsyncpa [#allocation5], 0  ;;  %s153_s0 = inlined_call_operand.<no memory space> [shape: f32[1], index: 0, kind: input, shape index: {}]   ;;  %s154_s1 = inlined_call_operand.hbm [shape: f32[2,8,128], index: 1, kind: input, shape index: {}]   ;;  %s155_s2 = inlined_call_operand.hbm [shape: f32[8,128], index: 2, kind: output, shape index: {}]  }
   0x1   :  { %9 = vsyncpa [#allocation6], 0  ;;  %s107_s9 = smov [#allocation4]   ;;  %s59_s13 = scalar_lea.hbm %s154_s1, 256 }
   0x2   :  { %s15_s10 = sshll.u32 %s107_s9, 4  ;;  %p60_p0 = scmp.ne.s32.totalorder %s154_s1, %s59_s13  ;;  %s16_s10 = int_to_ptr.vmem [resolvable:$true] %s15_s10 }
   0x3   :  { %p63_p1 = scmp.lt.u32.totalorder %s59_s13, %s154_s1 }
   0x5   :  { %p65_p2 = pnand %p63_p1, %p60_p0 }
   0x7   :  { %68 = shalt.err (!%p65_p2)
}
   0x8   :  { %s69_s18 = scalar_lea.vmem %s16_s10, 256  ;;  %p74_p4 = scmp.lt.s32.totalorder %s16_s10, %s16_s10 }
   0x9   :  { %p70_p3 = scmp.ne.s32.totalorder %s16_s10, %s69_s18  ;;  %p75_p5 = scmp.lt.s32.totalorder %s69_s18, %s69_s18 }
   0xb   :  { %p76_p6 = por %p75_p5, %p74_p4 }
   0xd   :  { %p77_p7 = pnand %p76_p6, %p70_p3 }
   0xf   :  { %80 = shalt.err (!%p77_p7)
}
  0x10   :  { %s108_s19 = smov 128   ;;  %s109_s20 = smov 8  }
  0x11   :  { %21 = dma.hbm_to_vmem [thread:$0]  %s154_s1, 256, %s16_s10, [#allocation5], %s108_s19, %s108_s19, %s109_s20  }
  0x12   :  { %103 = dma.done.wait [#allocation5], 256  }
  0x13   :  { %104 = vsyncadd [#allocation5], 4294967040  ;;  %s26_s25 = ssub.f32 0.0, %s153_s0  ;;  %v27_v0 = vld [vmem:[#allocation4] sm:$0xff]  ;;  %v29_v1 = vld [vmem:[#allocation4 + $0x8] sm:$0xff]  ;;  %s110_s26 = smov [#allocation7]  }
  0x14   :  { %v53_v2 = vadd.f32 -1.0, %v27_v0  ;;  %v54_v3 = vadd.f32 -1.0, %v29_v1  ;;  %s44_s27 = sshll.u32 %s110_s26, 4  ;;  %s45_s27 = int_to_ptr.vmem [resolvable:$true] %s44_s27 }
  0x15   :  { %v35_v6 = vstv %s26_s25  ;;  %s81_s1 = scalar_lea.vmem %s45_s27, 128  ;;  %p86_p9 = scmp.lt.s32.totalorder %s45_s27, %s45_s27 }
  0x16   :  { %v31_v4 = vmul.f32 %v53_v2, %v27_v0  ;;  %v33_v5 = vmul.f32 %v54_v3, %v29_v1  ;;  %p82_p8 = scmp.ne.s32.totalorder %s45_s27, %s81_s1  ;;  %p87_p10 = scmp.lt.s32.totalorder %s81_s1, %s81_s1 }
  0x18   :  { %v34_v7 = vadd.f32 %v33_v5, %v31_v4  ;;  %p88_p11 = por %p87_p10, %p86_p9 }
  0x1a   :  { %v36_v8 = vmul.f32 %v35_v6, %v34_v7  ;;  %p89_p12 = pnand %p88_p11, %p82_p8 }
  0x1c   :  { %37 = vst [vmem:[#allocation7] sm:$0xff] %v36_v8 }
  0x1d   :  { %92 = shalt.err (!%p89_p12)
}
  0x1e   :  { %s93_s29 = scalar_lea.hbm %s155_s2, 128 }
  0x1f   :  { %p94_p13 = scmp.ne.s32.totalorder %s155_s2, %s93_s29  ;;  %p97_p0 = scmp.lt.u32.totalorder %s93_s29, %s155_s2 }
  0x21   :  { %p99_p1 = pnand %p97_p0, %p94_p13 }
  0x23   :  { %102 = shalt.err (!%p99_p1)
}
  0x24   :  { %47 = dma.vmem_to_hbm [thread:$0]  %s45_s27, 128, %s155_s2, [#allocation6]  }
  0x25   :  { %105 = dma.done.wait [#allocation6], 128  }
  0x26   :  { %106 = vsyncadd [#allocation6], 4294967168 }
  0x27   :  { %51 = vsyncpa [#allocation5], 1 }
  0x28   :  { %52 = vsyncpa [#allocation6], 1 }

</bundles_post_ra>
